<compile_context>
chip_gen: v6e
topology: v6e:2x2x1
jax: 0.10.0
libtpu: 0.0.40
codegen_flags: <defaults>
</compile_context>

<pallas_src>
import jax
import jax.numpy as jnp
from jax.experimental import pallas as pl
from jax.experimental.pallas import tpu as pltpu


LANE = 128


def _round_up(n, m):
    return ((n + m - 1) // m) * m


def encoder_kernel(x_ref, w1_ref, b1_ref, w2_ref, b2_ref, z_ref):
    # Fused hot path, all in VMEM: cast -> matmul -> bias -> ReLU -> matmul -> bias.
    x = x_ref[...].astype(jnp.bfloat16)                               # in-kernel bf16 cast
    h = jnp.dot(x, w1_ref[...], preferred_element_type=jnp.float32)  # MXU, f32 accumulate
    h = jnp.maximum(h + b1_ref[...], 0.0)                            # bias + ReLU (f32, VPU)
    z = jnp.dot(h.astype(jnp.bfloat16), w2_ref[...],
                preferred_element_type=jnp.float32)                  # MXU, f32 accumulate
    z_ref[...] = (z + b2_ref[...]).astype(z_ref.dtype)               # unpadded f32 store


def encoder_forward(x, w1, b1, w2, b2, *, tile_b=1024):
    """z = model(x), model = Linear(in, latent_dim) -> ReLU -> Linear(latent_dim, dim_z)."""
    batch, in_features = x.shape
    latent_dim = w1.shape[1]
    dim_z = w2.shape[1]
    x_itemsize = jnp.dtype(x.dtype).itemsize

    # Pad only the hidden (internal) dimension of the small weight/bias arrays to a lane
    # multiple; K (= in_features) and Z (= dim_z) stay unpadded to match x / z exactly.
    # TODO(synk): if latent_dim/dim_z ever reach >=256, pad H/Z to multiples of 256 on
    #             v6e/v7x to fill the 2x256x256 MXU; irrelevant while memory-bound here.
    h_pad = _round_up(latent_dim, LANE)

    w1_p = jnp.zeros((in_features, h_pad), jnp.bfloat16).at[:, :latent_dim].set(
        w1.astype(jnp.bfloat16))
    b1_p = jnp.zeros((1, h_pad), jnp.float32).at[:, :latent_dim].set(
        b1.reshape(1, latent_dim).astype(jnp.float32))
    w2_p = jnp.zeros((h_pad, dim_z), jnp.bfloat16).at[:latent_dim, :].set(
        w2.astype(jnp.bfloat16))
    b2_p = b2.reshape(1, dim_z).astype(jnp.float32)

    # Batch tiling: one big tile if the batch fits (block == full dim is always legal),
    # otherwise tile_b rows per grid step (tile_b is a multiple of 8; ragged last tile OK).
    tb = tile_b if batch > tile_b else batch
    grid = (pl.cdiv(batch, tb),)

    # VMEM budget from the real footprint (double-buffered x/z tiles, resident weights,
    # in-kernel intermediates) with 2x headroom; comfortably fits v7x's 64 MiB.
    tile_bytes = tb * in_features * x_itemsize + tb * dim_z * 4
    weight_bytes = (in_features * h_pad + h_pad * dim_z) * 2 + (h_pad + dim_z) * 4
    inner_bytes = tb * h_pad * 4 + tb * h_pad * 2 + tb * in_features * 2
    vmem_limit = int(min(max(2 * (2 * tile_bytes + 2 * weight_bytes + inner_bytes),
                             16 * 1024 * 1024),
                         48 * 1024 * 1024))

    # Advisory cost so XLA can overlap this (small) kernel with surrounding ops.
    cost = pl.CostEstimate(
        flops=2 * batch * (in_features * latent_dim + latent_dim * dim_z),
        transcendentals=0,
        bytes_accessed=(batch * in_features * x_itemsize   # x read
                        + batch * dim_z * 4                 # z write
                        + weight_bytes),                    # weights (read once)
    )

    z = pl.pallas_call(
        encoder_kernel,
        out_shape=jax.ShapeDtypeStruct((batch, dim_z), jnp.float32),
        grid=grid,
        in_specs=[
            pl.BlockSpec((tb, in_features), lambda i: (i, 0)),   # x: streamed per batch tile
            pl.BlockSpec((in_features, h_pad), lambda i: (0, 0)),  # W1: VMEM-resident
            pl.BlockSpec((1, h_pad), lambda i: (0, 0)),            # b1: VMEM-resident
            pl.BlockSpec((h_pad, dim_z), lambda i: (0, 0)),        # W2: VMEM-resident
            pl.BlockSpec((1, dim_z), lambda i: (0, 0)),            # b2: VMEM-resident
        ],
        out_specs=pl.BlockSpec((tb, dim_z), lambda i: (i, 0)),
        compiler_params=pltpu.CompilerParams(
            dimension_semantics=("parallel",),   # independent batch tiles -> megacore on v7x
            vmem_limit_bytes=vmem_limit,
        ),
        cost_estimate=cost,
    )(x, w1_p, b1_p, w2_p, b2_p)

    return z


if __name__ == "__main__":
    # Small shapes implied by the module: args.latent_dim, args.dim_z.
    batch = 8
    in_features = 32
    latent_dim = 32
    dim_z = 16

    key = jax.random.PRNGKey(0)
    kx, kw1, kb1, kw2, kb2 = jax.random.split(key, 5)

    x = jax.random.normal(kx, (batch, in_features), dtype=jnp.float32)
    # Deterministic synthetic parameter init (no checkpoint loading).
    w1 = jax.random.normal(kw1, (in_features, latent_dim), dtype=jnp.float32) * 0.1
    b1 = jax.random.normal(kb1, (1, latent_dim), dtype=jnp.float32) * 0.01
    w2 = jax.random.normal(kw2, (latent_dim, dim_z), dtype=jnp.float32) * 0.1
    b2 = jax.random.normal(kb2, (1, dim_z), dtype=jnp.float32) * 0.01

    z = encoder_forward(x, w1, b1, w2, b2)
    z = jax.block_until_ready(z)

    # Pure-JAX f32 reference of the same forward pass. Tolerance accounts for bf16 MXU
    # operands (f32 accumulation) inside the kernel.
    z_ref = jnp.maximum(x @ w1 + b1, 0.0) @ w2 + b2
    assert z.shape == (batch, dim_z)
    assert jnp.allclose(z, z_ref, atol=2e-2, rtol=2e-2)

    print("KERNEL_OK")
</pallas_src>

<mosaic_0001>
module attributes {stable_mosaic.version = 11 : i64} {
  func.func @encoder_kernel(%arg0: i32, %arg1: memref<8x32xf32, #tpu.memory_space<vmem>>, %arg2: memref<32x128xbf16, #tpu.memory_space<vmem>>, %arg3: memref<1x128xf32, #tpu.memory_space<vmem>>, %arg4: memref<128x16xbf16, #tpu.memory_space<vmem>>, %arg5: memref<1x16xf32, #tpu.memory_space<vmem>>, %arg6: memref<8x16xf32, #tpu.memory_space<vmem>>) attributes {dimension_semantics = [#tpu.dimension_semantics<parallel>], iteration_bounds = array<i64: 1>, scalar_prefetch = 0 : i64, scratch_operands = 0 : i64, tpu.core_type = #tpu.core_type<tc>, window_params = [{transform_indices = @transform_0, window_bounds = array<i64: 8, 32>}, {pipeline_mode = #tpu.pipeline_mode<synchronous>, transform_indices = @transform_1, window_bounds = array<i64: 32, 128>}, {pipeline_mode = #tpu.pipeline_mode<synchronous>, transform_indices = @transform_2, window_bounds = array<i64: 1, 128>}, {pipeline_mode = #tpu.pipeline_mode<synchronous>, transform_indices = @transform_3, window_bounds = array<i64: 128, 16>}, {pipeline_mode = #tpu.pipeline_mode<synchronous>, transform_indices = @transform_4, window_bounds = array<i64: 1, 16>}, {transform_indices = @transform_5, window_bounds = array<i64: 8, 16>}]} {
    %c0 = arith.constant 0 : index
    %c0_0 = arith.constant 0 : index
    %0 = vector.load %arg1[%c0, %c0_0] : memref<8x32xf32, #tpu.memory_space<vmem>>, vector<8x32xf32>
    %1 = arith.truncf %0 : vector<8x32xf32> to vector<8x32xbf16>
    %c0_1 = arith.constant 0 : index
    %c0_2 = arith.constant 0 : index
    %2 = vector.load %arg2[%c0_1, %c0_2] : memref<32x128xbf16, #tpu.memory_space<vmem>>, vector<32x128xbf16>
    %cst = arith.constant dense<0.000000e+00> : vector<8x128xf32>
    %3 = tpu.matmul %1, %2, %cst {dimension_numbers = #tpu.dot_dimension_numbers<[1], [0], [0], [1], [0, 0, 1, 1], [], []>} : vector<8x32xbf16>, vector<32x128xbf16>, vector<8x128xf32> -> vector<8x128xf32>
    %c0_3 = arith.constant 0 : index
    %c0_4 = arith.constant 0 : index
    %4 = vector.load %arg3[%c0_3, %c0_4] : memref<1x128xf32, #tpu.memory_space<vmem>>, vector<1x128xf32>
    %5 = vector.broadcast %4 : vector<1x128xf32> to vector<8x128xf32>
    %6 = arith.addf %3, %5 : vector<8x128xf32>
    %cst_5 = arith.constant 0.000000e+00 : f32
    %7 = vector.broadcast %cst_5 : f32 to vector<8x128xf32>
    %8 = arith.maximumf %6, %7 : vector<8x128xf32>
    %9 = arith.truncf %8 : vector<8x128xf32> to vector<8x128xbf16>
    %c0_6 = arith.constant 0 : index
    %c0_7 = arith.constant 0 : index
    %10 = vector.load %arg4[%c0_6, %c0_7] : memref<128x16xbf16, #tpu.memory_space<vmem>>, vector<128x16xbf16>
    %cst_8 = arith.constant dense<0.000000e+00> : vector<8x16xf32>
    %11 = tpu.matmul %9, %10, %cst_8 {dimension_numbers = #tpu.dot_dimension_numbers<[1], [0], [0], [1], [0, 0, 1, 1], [], []>} : vector<8x128xbf16>, vector<128x16xbf16>, vector<8x16xf32> -> vector<8x16xf32>
    %c0_9 = arith.constant 0 : index
    %c0_10 = arith.constant 0 : index
    %12 = vector.load %arg5[%c0_9, %c0_10] : memref<1x16xf32, #tpu.memory_space<vmem>>, vector<1x16xf32>
    %13 = vector.broadcast %12 : vector<1x16xf32> to vector<8x16xf32>
    %14 = arith.addf %11, %13 : vector<8x16xf32>
    %c0_11 = arith.constant 0 : index
    %c0_12 = arith.constant 0 : index
    %15 = vector.load %arg6[%c0_11, %c0_12] : memref<8x16xf32, #tpu.memory_space<vmem>>, vector<8x16xf32>
    tpu.vector_store %arg6[%c0_11, %c0_12], %14 {strides = array<i32>} : memref<8x16xf32, #tpu.memory_space<vmem>>, vector<8x16xf32>,
    return
  }
  func.func @transform_0(%arg0: i32) -> (i32, i32) {
    %c0_i32 = arith.constant 0 : i32
    %c0_i32_0 = arith.constant 0 : i32
    return %arg0, %c0_i32 : i32, i32
  }
  func.func @transform_1(%arg0: i32) -> (i32, i32) {
    %c0_i32 = arith.constant 0 : i32
    %c0_i32_0 = arith.constant 0 : i32
    %c0_i32_1 = arith.constant 0 : i32
    return %c0_i32, %c0_i32_0 : i32, i32
  }
  func.func @transform_2(%arg0: i32) -> (i32, i32) {
    %c0_i32 = arith.constant 0 : i32
    %c0_i32_0 = arith.constant 0 : i32
    %c0_i32_1 = arith.constant 0 : i32
    return %c0_i32, %c0_i32_0 : i32, i32
  }
  func.func @transform_3(%arg0: i32) -> (i32, i32) {
    %c0_i32 = arith.constant 0 : i32
    %c0_i32_0 = arith.constant 0 : i32
    %c0_i32_1 = arith.constant 0 : i32
    return %c0_i32, %c0_i32_0 : i32, i32
  }
  func.func @transform_4(%arg0: i32) -> (i32, i32) {
    %c0_i32 = arith.constant 0 : i32
    %c0_i32_0 = arith.constant 0 : i32
    %c0_i32_1 = arith.constant 0 : i32
    return %c0_i32, %c0_i32_0 : i32, i32
  }
  func.func @transform_5(%arg0: i32) -> (i32, i32) {
    %c0_i32 = arith.constant 0 : i32
    %c0_i32_0 = arith.constant 0 : i32
    return %arg0, %c0_i32 : i32, i32
  }
}

</mosaic_0001>

<bundles_post_ra>
// kernel: tpu_custom_call.1
= control target key start
LH: loop header
LB: loop body
LE: loop exit
PB: predicated region body
PF: predicated region fallthrough
CT: control target
= control target key end

     0   :  { %v308_v1 = vmov 0.0   ;;  %vm309_vm0 = vmmov 0   ;;  %vm47_vm1 = vcmask 261120   ;;  %s383_s0 = inlined_call_operand.vmem [shape: f32[8,32], index: 0, kind: input, shape index: {}]   ;;  %s384_s1 = inlined_call_operand.vmem [shape: bf16[32,128], index: 1, kind: input, shape index: {}]   ;;  %s385_s2 = inlined_call_operand.vmem [shape: f32[1,128], index: 2, kind: input, shape index: {}]   ;;  %s386_s3 = inlined_call_operand.vmem [shape: bf16[128,16], index: 3, kind: input, shape index: {}]   ;;  %s387_s4 = inlined_call_operand.vmem [shape: f32[1,16], index: 4, kind: input, shape index: {}]   ;;  %s388_s5 = inlined_call_operand.hbm [shape: f32[8,16], index: 5, kind: output, shape index: {}]  }
   0x1   :  { %v276_v0 = vld [vmem:[%s384_s1 + $0x8] sm:$0xff]   ;;  %245 = vmatprep.subr.bf16.mxu0 %v308_v1  ;;  %v277_v2 = vld [vmem:[%s384_s1] sm:$0xff]   ;;  %253 = vmatprep.subr.bf16.mxu1 %v308_v1  ;;  %v278_v4 = vld [vmem:[%s386_s3 + $0x38] sm:$0xff]  }
   0x2   :  { %246 = vmatpush3.bf16.msra.mxu0 %v276_v0  ;;  %249 = vmatprep.mubr.msk.bf16.mxu0 %vm309_vm0, %v308_v1  ;;  %v22_v3 = vld [vmem:[%s383_s0] sm:$0xff]  ;;  %v279_v6 = vld [vmem:[%s386_s3 + $0x30] sm:$0xff]   ;;  %v280_v7 = vld [vmem:[%s386_s3 + $0x28] sm:$0xff]  }
   0x3   :  { %247 = vmatprep.subr.bf16.mxu0 %v308_v1  ;;  %269 = vmatprep.mubr.msk.bf16.mxu1 %vm309_vm0, %v308_v1  ;;  %v23_v5 = vpack.c.bf16 %v22_v3, %v22_v3 }
   0x4   :  { %254 = vmatpush3.bf16.msra.mxu1 %v278_v4 }
   0x5   :  { %255 = vmatprep.subr.bf16.mxu1 %v308_v1 }
   0x6   :  { %248 = vmatpush3.bf16.msra.mxu0 %v277_v2 }
   0x8   :  { %256 = vmatpush3.bf16.msra.mxu1 %v279_v6 }
   0x9   :  { %250 = vmatmul.mubr.msk.bf16.vlgmr.msra.gmra.mxu0 %vm47_vm1, %v23_v5  ;;  %257 = vmatprep.subr.bf16.mxu1 %v308_v1 }
   0xa   :  { %10 = vsyncpa [#allocation3], 0  ;;  %v281_v8 = vld [vmem:[%s386_s3 + $0x20] sm:$0xff]   ;;  %v282_v9 = vld [vmem:[%s386_s3 + $0x18] sm:$0xff]   ;;  %s310_s17 = smov [#allocation2]   ;;  %vm204_vm2 = vcmask 130048  }
   0xb   :  { %v283_v10 = vld [vmem:[%s386_s3 + $0x10] sm:$0xff]   ;;  %v284_v11 = vld [vmem:[%s386_s3 + $0x8] sm:$0xff]   ;;  %v285_v12 = vld [vmem:[%s386_s3] sm:$0xff]   ;;  %s212_s18 = sshll.u32 %s310_s17, 4  ;;  %s213_s18 = int_to_ptr.vmem [resolvable:$true] %s212_s18 }
   0xc   :  { %258 = vmatpush3.bf16.msra.mxu1 %v280_v7  ;;  %v220_v13 = vld [vmem:[%s385_s2] ss:$0 sm:$0xff]  ;;  %s286_s2 = scalar_lea.vmem %s213_s18, 128  ;;  %p291_p1 = scmp.lt.s32.totalorder %s213_s18, %s213_s18 }
   0xd   :  { %259 = vmatprep.subr.bf16.mxu1 %v308_v1  ;;  %v224_v21 = vld [vmem:[%s387_s4] ss:$0 sm:$0xff]  ;;  %p287_p0 = scmp.ne.s32.totalorder %s213_s18, %s286_s2  ;;  %p292_p2 = scmp.lt.s32.totalorder %s286_s2, %s286_s2 }
   0xf   :  { %p293_p3 = por %p292_p2, %p291_p1 }
  0x10   :  { %260 = vmatpush3.bf16.msra.mxu1 %v281_v8 }
  0x11   :  { %261 = vmatprep.subr.bf16.mxu1 %v308_v1  ;;  %p294_p4 = pnand %p293_p3, %p287_p0 }
  0x14   :  { %262 = vmatpush3.bf16.msra.mxu1 %v282_v9 }
  0x15   :  { %263 = vmatprep.subr.bf16.mxu1 %v308_v1 }
  0x18   :  { %264 = vmatpush3.bf16.msra.mxu1 %v283_v10 }
  0x19   :  { %265 = vmatprep.subr.bf16.mxu1 %v308_v1 }
  0x1c   :  { %266 = vmatpush3.bf16.msra.mxu1 %v284_v11 }
  0x1d   :  { %267 = vmatprep.subr.bf16.mxu1 %v308_v1 }
  0x20   :  { %268 = vmatpush3.bf16.msra.mxu1 %v285_v12 }
  0xc9   :  { %v85_v14 = vpop.f32.mrf.mxu0 }
  0xca   :  { %v86_v15 = vadd.f32 %v220_v13, %v85_v14 }
  0xcb   :  { %v251_v16 = vpop.f32.mrf.mxu0 }
  0xcc   :  { %v91_v17 = vmax.f32 %v86_v15, 0.0 }
  0xcd   :  { %v88_v18 = vpop.f32.mrf.mxu0 }
  0xce   :  { %v92_v19 = vpack.c.bf16 %v91_v17, %v91_v17 }
  0xcf   :  { %v252_v20 = vpop.f32.mrf.mxu0 }
  0xd0   :  { %270 = vmatmul.mubr.bf16.vlgmr.msra.gmra.mxu1 %v92_v19 }
 0x190   :  { %v198_v22 = vpop.f32.mrf.mxu1 }
 0x191   :  { %v199_v23 = vadd.f32 %v224_v21, %v198_v22 }
 0x192   :  { %v271_v24 = vpop.f32.mrf.mxu1 }
 0x193   :  { %205 = vst.msk [vmem:[#allocation2] sm:$0xff] %vm204_vm2, %v199_v23 }
 0x194   :  { %v201_v25 = vpop.f32.mrf.mxu1 }
 0x195   :  { %297 = shalt.err (!%p294_p4)
}
 0x196   :  { %215 = dma.vmem_to_hbm [thread:$0]  %s213_s18, 128, %s388_s5, [#allocation3]   ;;  %v272_v26 = vpop.f32.mrf.mxu1 }
 0x197   :  { %306 = dma.done.wait [#allocation3], 128  }
 0x198   :  { %307 = vsyncadd [#allocation3], 4294967168 }
 0x199   :  { %219 = vsyncpa [#allocation3], 1 }

</bundles_post_ra>
